<compile_context>
chip_gen: v7x
topology: tpu7x:2x2x1
jax: 0.10.0
libtpu: 0.0.40
codegen_flags: <defaults>
</compile_context>

<pallas_src>
import jax
import jax.numpy as jnp
from jax.experimental import pallas as pl
from jax.experimental.pallas import tpu as pltpu

HIDDEN = 128        # Model.hidden_size
DEC_DIM = 16        # Model.decoder_input_dim
TEMP_HIDDEN = 32    # Model.temporal_decoder_hidden


# ----------------------------- fused kernel ---------------------------------
def _tide_fused_kernel(xf_ref,
                       w1e_ref, b1e_ref, w2e_ref, wse_ref, be_ref,
                       w1d_ref, b1d_ref,
                       wh3a_ref, wh3b_ref, bh3_ref,
                       bd2_ref, wtsa_ref, wtsb_ref, wls_ref, bout_ref,
                       o_ref):
    f32, bf = jnp.float32, jnp.bfloat16

    def dot(a, b_ref):
        return jnp.dot(a, b_ref[...], preferred_element_type=f32)

    xf = xf_ref[...]                                           # (TB, L*C) bf16

    # encoder ResidualBlock: dense(L*C->H->H) + skip(L*C->H), biases pre-summed
    h = jnp.maximum(dot(xf, w1e_ref) + b1e_ref[...], 0.0).astype(bf)
    enc = (dot(h, w2e_ref) + dot(xf, wse_ref) + be_ref[...]).astype(bf)

    # decoder ResidualBlock hidden: dense-1(H->H)
    h2 = jnp.maximum(dot(enc, w1d_ref) + b1d_ref[...], 0.0).astype(bf)

    # decoder output folded with the temporal-decoder first linear:
    #   h3 = relu(dec @ blockdiag_P(wt1) + tile(bt1))   (dec never materialized)
    h3 = jnp.maximum(dot(h2, wh3a_ref) + dot(enc, wh3b_ref) + bh3_ref[...],
                     0.0).astype(bf)

    # single lane-dense (TB, P*C) result:
    #   temporal dense-2 (h3 @ blockdiag_P(wt2))
    # + temporal skip folded into decoder weights (dec @ blockdiag_P(wts))
    # + lookback skip (xf @ channel-expanded wls)
    # + all remaining biases pre-summed into bout
    o_ref[...] = (dot(h3, bd2_ref) + dot(h2, wtsa_ref) + dot(enc, wtsb_ref)
                  + dot(xf, wls_ref) + bout_ref[...])


_WEIGHT_KEYS = ("w1e", "b1e", "w2e", "wse", "b_enc", "w1d", "b1d",
                "wh3a", "wh3b", "bh3", "bd2", "wtsa", "wtsb", "wls", "bout")


def _pick_batch_tile(batch):
    """<=256 rows (v6e/v7x MXU width), sublane-aligned, and >=2 grid steps
    once the batch is big enough (v7x has 2 TensorCores)."""
    if batch <= 8:
        return batch
    tb = min(256, batch)
    if tb >= batch:                       # would leave a single grid step
        tb = ((batch + 1) // 2 + 7) // 8 * 8
    return min(tb, batch)


def _tide_forward(x, kp):
    B, L, C = x.shape
    LC = L * C
    PC = kp["bout"].shape[1]              # pred_len * enc_in
    HP = kp["bh3"].shape[1]                # 32 * pred_len

    xf = x.astype(jnp.bfloat16).reshape(B, LC)   # free view; no transpose pass

    TB = _pick_batch_tile(B)
    nb = pl.cdiv(B, TB)

    weights = tuple(kp[k] for k in _WEIGHT_KEYS)
    w_specs = [pl.BlockSpec(w.shape, lambda i: (0, 0)) for w in weights]

    # VMEM budget: resident weights (double-buffered by default), double-
    # buffered x/out tiles, activation slack; clamp to 32 MiB for v7x headroom.
    wbytes = sum(int(w.size) * w.dtype.itemsize for w in weights)
    tile_bytes = TB * (2 * LC + 4 * PC)
    act_bytes = 4 * TB * (LC + 4 * HIDDEN + HP + PC)
    vmem_limit = int(min(2 * wbytes + 2 * tile_bytes + 4 * act_bytes + (8 << 20),
                         32 << 20))

    y = pl.pallas_call(
        _tide_fused_kernel,
        grid=(nb,),
        out_shape=jax.ShapeDtypeStruct((B, PC), jnp.float32),
        in_specs=[pl.BlockSpec((TB, LC), lambda i: (i, 0))] + w_specs,
        out_specs=pl.BlockSpec((TB, PC), lambda i: (i, 0)),
        compiler_params=pltpu.CompilerParams(
            dimension_semantics=("parallel",),
            vmem_limit_bytes=vmem_limit),
    )(xf, *weights)
    return y.reshape(B, PC // C, C)


tide_forward = jax.jit(_tide_forward)


# ----------------------------- parameters -----------------------------------
def init_raw_params(key, seq_len, pred_len, enc_in):
    """Raw PyTorch-style weights (Linear weights stored already transposed)."""
    H, D, TH = HIDDEN, DEC_DIM, TEMP_HIDDEN
    enc_dim = seq_len * enc_in
    keys = jax.random.split(key, 10)

    def lin(k, din, dout):
        kw, kb = jax.random.split(k)
        w = jax.random.normal(kw, (din, dout), jnp.float32) / jnp.sqrt(float(din))
        b = 0.1 * jax.random.normal(kb, (dout,), jnp.float32)
        return w, b

    p = {}
    p["w1e"], p["b1e"] = lin(keys[0], enc_dim, H)           # encoder dense-1
    p["w2e"], p["b2e"] = lin(keys[1], H, H)                 # encoder dense-2
    p["wse"], p["bse"] = lin(keys[2], enc_dim, H)           # encoder skip
    p["w1d"], p["b1d"] = lin(keys[3], H, H)                 # decoder dense-1
    p["w2d"], p["b2d"] = lin(keys[4], H, D * pred_len)      # decoder dense-2
    p["wsd"], p["bsd"] = lin(keys[5], H, D * pred_len)      # decoder skip
    p["wt1"], p["bt1"] = lin(keys[6], D, TH)                # temporal dense-1
    p["wt2"], p["bt2"] = lin(keys[7], TH, enc_in)           # temporal dense-2
    p["wts"], p["bts"] = lin(keys[8], D, enc_in)            # temporal skip
    p["wls"], p["bls"] = lin(keys[9], seq_len, pred_len)    # lookback skip
    return p


def _blockdiag(w, reps):
    k, j = w.shape
    eye = jnp.eye(reps, dtype=w.dtype)
    return (eye[:, None, :, None] * w[None, :, None, :]).reshape(reps * k, reps * j)


def prepare_params(raw, seq_len, pred_len, enc_in):
    """One-time weight folding so the fused kernel does zero relayout work."""
    bf = jnp.bfloat16
    L, P, C = seq_len, pred_len, enc_in
    b_dec = raw["b2d"] + raw["bsd"]                            # (16P,)
    bd1 = _blockdiag(raw["wt1"], P)                            # (16P, 32P)
    bds = _blockdiag(raw["wts"], P)                            # (16P, C*P)
    bd2 = _blockdiag(raw["wt2"], P)                            # (32P, C*P)
    # lookback skip expanded across channels:
    #   wls_exp[l*C+ci, p*C+co] = wls[l, p] * (ci == co)
    eye_c = jnp.eye(C, dtype=jnp.float32)
    wls_exp = (raw["wls"][:, None, :, None] * eye_c[None, :, None, :]
               ).reshape(L * C, P * C)
    return {
        "w1e": raw["w1e"].astype(bf),
        "b1e": raw["b1e"].reshape(1, -1),
        "w2e": raw["w2e"].astype(bf),
        "wse": raw["wse"].astype(bf),
        "b_enc": (raw["b2e"] + raw["bse"]).reshape(1, -1),
        "w1d": raw["w1d"].astype(bf),
        "b1d": raw["b1d"].reshape(1, -1),
        "wh3a": (raw["w2d"] @ bd1).astype(bf),
        "wh3b": (raw["wsd"] @ bd1).astype(bf),
        "bh3": (b_dec @ bd1 + jnp.tile(raw["bt1"], P)).reshape(1, -1),
        "bd2": bd2.astype(bf),
        "wtsa": (raw["w2d"] @ bds).astype(bf),
        "wtsb": (raw["wsd"] @ bds).astype(bf),
        "wls": wls_exp.astype(bf),
        "bout": (b_dec @ bds + jnp.tile(raw["bt2"] + raw["bts"], P)
                 + jnp.repeat(raw["bls"], C)).reshape(1, -1),
    }


# ----------------------------- references -----------------------------------
def kernel_math_reference(x, kp):
    """Pure-JAX mirror of the fused kernel math (same folded bf16 params and
    cast points) -- tight numeric check of the Pallas lowering."""
    B, L, C = x.shape
    f32, bf = jnp.float32, jnp.bfloat16
    dot = lambda a, b: jnp.dot(a, b, preferred_element_type=f32)
    xf = x.astype(bf).reshape(B, L * C)
    h = jnp.maximum(dot(xf, kp["w1e"]) + kp["b1e"], 0.0).astype(bf)
    enc = (dot(h, kp["w2e"]) + dot(xf, kp["wse"]) + kp["b_enc"]).astype(bf)
    h2 = jnp.maximum(dot(enc, kp["w1d"]) + kp["b1d"], 0.0).astype(bf)
    h3 = jnp.maximum(dot(h2, kp["wh3a"]) + dot(enc, kp["wh3b"]) + kp["bh3"],
                     0.0).astype(bf)
    return (dot(h3, kp["bd2"]) + dot(h2, kp["wtsa"]) + dot(enc, kp["wtsb"])
            + dot(xf, kp["wls"]) + kp["bout"])


def torch_structure_reference(x, raw):
    """f32 reference following the PyTorch Model.forward layer by layer with
    the RAW (un-folded) weights -- structural check of the weight folding.
    (Deviates from the kernel only at the bf16 rounding level.)"""
    hi = jax.lax.Precision.HIGHEST
    B, L, C = x.shape
    P = raw["wls"].shape[1]
    xf = x.reshape(B, L * C)                                   # flatten(1)
    # encoders: ResidualBlock(L*C -> 128)
    h = jnp.maximum(jnp.dot(xf, raw["w1e"], precision=hi) + raw["b1e"], 0.0)
    enc = (jnp.dot(h, raw["w2e"], precision=hi) + raw["b2e"]
           + jnp.dot(xf, raw["wse"], precision=hi) + raw["bse"])
    # decoders: ResidualBlock(128 -> 16*P)
    h2 = jnp.maximum(jnp.dot(enc, raw["w1d"], precision=hi) + raw["b1d"], 0.0)
    dec = (jnp.dot(h2, raw["w2d"], precision=hi) + raw["b2d"]
           + jnp.dot(enc, raw["wsd"], precision=hi) + raw["bsd"])
    dec3 = dec.reshape(B, P, DEC_DIM)                          # .view(B, P, 16)
    # temporal decoder: ResidualBlock(16 -> C) per (b, p)
    h3 = jnp.maximum(
        jnp.einsum("bpk,kj->bpj", dec3, raw["wt1"], precision=hi) + raw["bt1"],
        0.0)
    td = (jnp.einsum("bpj,jc->bpc", h3, raw["wt2"], precision=hi) + raw["bt2"]
          + jnp.einsum("bpk,kc->bpc", dec3, raw["wts"], precision=hi)
          + raw["bts"])
    # lookback skip: Linear(L -> P) on x.transpose(1, 2), transposed back
    skip = (jnp.einsum("blc,lp->bpc", x, raw["wls"], precision=hi)
            + raw["bls"][None, :, None])
    return td + skip


# ----------------------------- test -----------------------------------------
if __name__ == "__main__":
    # Small shapes: batch=2, seq_len=8, enc_in=4, pred_len=4.
    B, L, C, P = 2, 8, 4, 4
    key = jax.random.PRNGKey(0)
    kx, kw = jax.random.split(key)
    x = jax.random.normal(kx, (B, L, C), jnp.float32)
    # x_mark / y_true / y_mark are unused by the PyTorch forward; omitted.
    raw = init_raw_params(kw, L, P, C)
    kp = prepare_params(raw, L, P, C)

    y = tide_forward(x, kp)
    y = jax.block_until_ready(y)
    assert y.shape == (B, P, C)

    # 1) tight check vs the kernel-math mirror (same bf16 folded params)
    ref_tight = kernel_math_reference(x, kp).reshape(B, P, C)
    assert jnp.allclose(y, ref_tight, atol=2e-3, rtol=2e-3), \
        float(jnp.max(jnp.abs(y - ref_tight)))

    # 2) structural check vs the f32 PyTorch-shaped forward with raw weights
    ref_torch = torch_structure_reference(x, raw)
    assert jnp.allclose(y, ref_torch, atol=0.12, rtol=0.12), \
        float(jnp.max(jnp.abs(y - ref_torch)))

    print("KERNEL_OK")
</pallas_src>

<mosaic_0001>
module attributes {stable_mosaic.version = 11 : i64} {
  func.func @_tide_fused_kernel(%arg0: i32, %arg1: memref<2x32xbf16, #tpu.memory_space<vmem>>, %arg2: memref<32x128xbf16, #tpu.memory_space<vmem>>, %arg3: memref<1x128xf32, #tpu.memory_space<vmem>>, %arg4: memref<128x128xbf16, #tpu.memory_space<vmem>>, %arg5: memref<32x128xbf16, #tpu.memory_space<vmem>>, %arg6: memref<1x128xf32, #tpu.memory_space<vmem>>, %arg7: memref<128x128xbf16, #tpu.memory_space<vmem>>, %arg8: memref<1x128xf32, #tpu.memory_space<vmem>>, %arg9: memref<128x128xbf16, #tpu.memory_space<vmem>>, %arg10: memref<128x128xbf16, #tpu.memory_space<vmem>>, %arg11: memref<1x128xf32, #tpu.memory_space<vmem>>, %arg12: memref<128x16xbf16, #tpu.memory_space<vmem>>, %arg13: memref<128x16xbf16, #tpu.memory_space<vmem>>, %arg14: memref<128x16xbf16, #tpu.memory_space<vmem>>, %arg15: memref<32x16xbf16, #tpu.memory_space<vmem>>, %arg16: memref<1x16xf32, #tpu.memory_space<vmem>>, %arg17: memref<2x16xf32, #tpu.memory_space<vmem>>) attributes {dimension_semantics = [#tpu.dimension_semantics<parallel>], iteration_bounds = array<i64: 1>, scalar_prefetch = 0 : i64, scratch_operands = 0 : i64, tpu.core_type = #tpu.core_type<tc>, window_params = [{transform_indices = @transform_0, window_bounds = array<i64: 2, 32>}, {pipeline_mode = #tpu.pipeline_mode<synchronous>, transform_indices = @transform_1, window_bounds = array<i64: 32, 128>}, {pipeline_mode = #tpu.pipeline_mode<synchronous>, transform_indices = @transform_2, window_bounds = array<i64: 1, 128>}, {pipeline_mode = #tpu.pipeline_mode<synchronous>, transform_indices = @transform_3, window_bounds = array<i64: 128, 128>}, {pipeline_mode = #tpu.pipeline_mode<synchronous>, transform_indices = @transform_4, window_bounds = array<i64: 32, 128>}, {pipeline_mode = #tpu.pipeline_mode<synchronous>, transform_indices = @transform_5, window_bounds = array<i64: 1, 128>}, {pipeline_mode = #tpu.pipeline_mode<synchronous>, transform_indices = @transform_6, window_bounds = array<i64: 128, 128>}, {pipeline_mode = #tpu.pipeline_mode<synchronous>, transform_indices = @transform_7, window_bounds = array<i64: 1, 128>}, {pipeline_mode = #tpu.pipeline_mode<synchronous>, transform_indices = @transform_8, window_bounds = array<i64: 128, 128>}, {pipeline_mode = #tpu.pipeline_mode<synchronous>, transform_indices = @transform_9, window_bounds = array<i64: 128, 128>}, {pipeline_mode = #tpu.pipeline_mode<synchronous>, transform_indices = @transform_10, window_bounds = array<i64: 1, 128>}, {pipeline_mode = #tpu.pipeline_mode<synchronous>, transform_indices = @transform_11, window_bounds = array<i64: 128, 16>}, {pipeline_mode = #tpu.pipeline_mode<synchronous>, transform_indices = @transform_12, window_bounds = array<i64: 128, 16>}, {pipeline_mode = #tpu.pipeline_mode<synchronous>, transform_indices = @transform_13, window_bounds = array<i64: 128, 16>}, {pipeline_mode = #tpu.pipeline_mode<synchronous>, transform_indices = @transform_14, window_bounds = array<i64: 32, 16>}, {pipeline_mode = #tpu.pipeline_mode<synchronous>, transform_indices = @transform_15, window_bounds = array<i64: 1, 16>}, {transform_indices = @transform_16, window_bounds = array<i64: 2, 16>}]} {
    %c0 = arith.constant 0 : index
    %c0_0 = arith.constant 0 : index
    %0 = vector.load %arg1[%c0, %c0_0] : memref<2x32xbf16, #tpu.memory_space<vmem>>, vector<2x32xbf16>
    %c0_1 = arith.constant 0 : index
    %c0_2 = arith.constant 0 : index
    %1 = vector.load %arg2[%c0_1, %c0_2] : memref<32x128xbf16, #tpu.memory_space<vmem>>, vector<32x128xbf16>
    %cst = arith.constant dense<0.000000e+00> : vector<2x128xf32>
    %2 = tpu.matmul %0, %1, %cst {dimension_numbers = #tpu.dot_dimension_numbers<[1], [0], [0], [1], [0, 0, 1, 1], [], []>} : vector<2x32xbf16>, vector<32x128xbf16>, vector<2x128xf32> -> vector<2x128xf32>
    %c0_3 = arith.constant 0 : index
    %c0_4 = arith.constant 0 : index
    %3 = vector.load %arg3[%c0_3, %c0_4] : memref<1x128xf32, #tpu.memory_space<vmem>>, vector<1x128xf32>
    %4 = vector.broadcast %3 : vector<1x128xf32> to vector<2x128xf32>
    %5 = arith.addf %2, %4 : vector<2x128xf32>
    %cst_5 = arith.constant 0.000000e+00 : f32
    %6 = vector.broadcast %cst_5 : f32 to vector<2x128xf32>
    %7 = arith.maximumf %5, %6 : vector<2x128xf32>
    %8 = arith.truncf %7 : vector<2x128xf32> to vector<2x128xbf16>
    %c0_6 = arith.constant 0 : index
    %c0_7 = arith.constant 0 : index
    %9 = vector.load %arg4[%c0_6, %c0_7] : memref<128x128xbf16, #tpu.memory_space<vmem>>, vector<128x128xbf16>
    %cst_8 = arith.constant dense<0.000000e+00> : vector<2x128xf32>
    %10 = tpu.matmul %8, %9, %cst_8 {dimension_numbers = #tpu.dot_dimension_numbers<[1], [0], [0], [1], [0, 0, 1, 1], [], []>} : vector<2x128xbf16>, vector<128x128xbf16>, vector<2x128xf32> -> vector<2x128xf32>
    %c0_9 = arith.constant 0 : index
    %c0_10 = arith.constant 0 : index
    %11 = vector.load %arg5[%c0_9, %c0_10] : memref<32x128xbf16, #tpu.memory_space<vmem>>, vector<32x128xbf16>
    %cst_11 = arith.constant dense<0.000000e+00> : vector<2x128xf32>
    %12 = tpu.matmul %0, %11, %cst_11 {dimension_numbers = #tpu.dot_dimension_numbers<[1], [0], [0], [1], [0, 0, 1, 1], [], []>} : vector<2x32xbf16>, vector<32x128xbf16>, vector<2x128xf32> -> vector<2x128xf32>
    %13 = arith.addf %10, %12 : vector<2x128xf32>
    %c0_12 = arith.constant 0 : index
    %c0_13 = arith.constant 0 : index
    %14 = vector.load %arg6[%c0_12, %c0_13] : memref<1x128xf32, #tpu.memory_space<vmem>>, vector<1x128xf32>
    %15 = vector.broadcast %14 : vector<1x128xf32> to vector<2x128xf32>
    %16 = arith.addf %13, %15 : vector<2x128xf32>
    %17 = arith.truncf %16 : vector<2x128xf32> to vector<2x128xbf16>
    %c0_14 = arith.constant 0 : index
    %c0_15 = arith.constant 0 : index
    %18 = vector.load %arg7[%c0_14, %c0_15] : memref<128x128xbf16, #tpu.memory_space<vmem>>, vector<128x128xbf16>
    %cst_16 = arith.constant dense<0.000000e+00> : vector<2x128xf32>
    %19 = tpu.matmul %17, %18, %cst_16 {dimension_numbers = #tpu.dot_dimension_numbers<[1], [0], [0], [1], [0, 0, 1, 1], [], []>} : vector<2x128xbf16>, vector<128x128xbf16>, vector<2x128xf32> -> vector<2x128xf32>
    %c0_17 = arith.constant 0 : index
    %c0_18 = arith.constant 0 : index
    %20 = vector.load %arg8[%c0_17, %c0_18] : memref<1x128xf32, #tpu.memory_space<vmem>>, vector<1x128xf32>
    %21 = vector.broadcast %20 : vector<1x128xf32> to vector<2x128xf32>
    %22 = arith.addf %19, %21 : vector<2x128xf32>
    %cst_19 = arith.constant 0.000000e+00 : f32
    %23 = vector.broadcast %cst_19 : f32 to vector<2x128xf32>
    %24 = arith.maximumf %22, %23 : vector<2x128xf32>
    %25 = arith.truncf %24 : vector<2x128xf32> to vector<2x128xbf16>
    %c0_20 = arith.constant 0 : index
    %c0_21 = arith.constant 0 : index
    %26 = vector.load %arg9[%c0_20, %c0_21] : memref<128x128xbf16, #tpu.memory_space<vmem>>, vector<128x128xbf16>
    %cst_22 = arith.constant dense<0.000000e+00> : vector<2x128xf32>
    %27 = tpu.matmul %25, %26, %cst_22 {dimension_numbers = #tpu.dot_dimension_numbers<[1], [0], [0], [1], [0, 0, 1, 1], [], []>} : vector<2x128xbf16>, vector<128x128xbf16>, vector<2x128xf32> -> vector<2x128xf32>
    %c0_23 = arith.constant 0 : index
    %c0_24 = arith.constant 0 : index
    %28 = vector.load %arg10[%c0_23, %c0_24] : memref<128x128xbf16, #tpu.memory_space<vmem>>, vector<128x128xbf16>
    %cst_25 = arith.constant dense<0.000000e+00> : vector<2x128xf32>
    %29 = tpu.matmul %17, %28, %cst_25 {dimension_numbers = #tpu.dot_dimension_numbers<[1], [0], [0], [1], [0, 0, 1, 1], [], []>} : vector<2x128xbf16>, vector<128x128xbf16>, vector<2x128xf32> -> vector<2x128xf32>
    %30 = arith.addf %27, %29 : vector<2x128xf32>
    %c0_26 = arith.constant 0 : index
    %c0_27 = arith.constant 0 : index
    %31 = vector.load %arg11[%c0_26, %c0_27] : memref<1x128xf32, #tpu.memory_space<vmem>>, vector<1x128xf32>
    %32 = vector.broadcast %31 : vector<1x128xf32> to vector<2x128xf32>
    %33 = arith.addf %30, %32 : vector<2x128xf32>
    %cst_28 = arith.constant 0.000000e+00 : f32
    %34 = vector.broadcast %cst_28 : f32 to vector<2x128xf32>
    %35 = arith.maximumf %33, %34 : vector<2x128xf32>
    %36 = arith.truncf %35 : vector<2x128xf32> to vector<2x128xbf16>
    %c0_29 = arith.constant 0 : index
    %c0_30 = arith.constant 0 : index
    %37 = vector.load %arg12[%c0_29, %c0_30] : memref<128x16xbf16, #tpu.memory_space<vmem>>, vector<128x16xbf16>
    %cst_31 = arith.constant dense<0.000000e+00> : vector<2x16xf32>
    %38 = tpu.matmul %36, %37, %cst_31 {dimension_numbers = #tpu.dot_dimension_numbers<[1], [0], [0], [1], [0, 0, 1, 1], [], []>} : vector<2x128xbf16>, vector<128x16xbf16>, vector<2x16xf32> -> vector<2x16xf32>
    %c0_32 = arith.constant 0 : index
    %c0_33 = arith.constant 0 : index
    %39 = vector.load %arg13[%c0_32, %c0_33] : memref<128x16xbf16, #tpu.memory_space<vmem>>, vector<128x16xbf16>
    %cst_34 = arith.constant dense<0.000000e+00> : vector<2x16xf32>
    %40 = tpu.matmul %25, %39, %cst_34 {dimension_numbers = #tpu.dot_dimension_numbers<[1], [0], [0], [1], [0, 0, 1, 1], [], []>} : vector<2x128xbf16>, vector<128x16xbf16>, vector<2x16xf32> -> vector<2x16xf32>
    %41 = arith.addf %38, %40 : vector<2x16xf32>
    %c0_35 = arith.constant 0 : index
    %c0_36 = arith.constant 0 : index
    %42 = vector.load %arg14[%c0_35, %c0_36] : memref<128x16xbf16, #tpu.memory_space<vmem>>, vector<128x16xbf16>
    %cst_37 = arith.constant dense<0.000000e+00> : vector<2x16xf32>
    %43 = tpu.matmul %17, %42, %cst_37 {dimension_numbers = #tpu.dot_dimension_numbers<[1], [0], [0], [1], [0, 0, 1, 1], [], []>} : vector<2x128xbf16>, vector<128x16xbf16>, vector<2x16xf32> -> vector<2x16xf32>
    %44 = arith.addf %41, %43 : vector<2x16xf32>
    %c0_38 = arith.constant 0 : index
    %c0_39 = arith.constant 0 : index
    %45 = vector.load %arg15[%c0_38, %c0_39] : memref<32x16xbf16, #tpu.memory_space<vmem>>, vector<32x16xbf16>
    %cst_40 = arith.constant dense<0.000000e+00> : vector<2x16xf32>
    %46 = tpu.matmul %0, %45, %cst_40 {dimension_numbers = #tpu.dot_dimension_numbers<[1], [0], [0], [1], [0, 0, 1, 1], [], []>} : vector<2x32xbf16>, vector<32x16xbf16>, vector<2x16xf32> -> vector<2x16xf32>
    %47 = arith.addf %44, %46 : vector<2x16xf32>
    %c0_41 = arith.constant 0 : index
    %c0_42 = arith.constant 0 : index
    %48 = vector.load %arg16[%c0_41, %c0_42] : memref<1x16xf32, #tpu.memory_space<vmem>>, vector<1x16xf32>
    %49 = vector.broadcast %48 : vector<1x16xf32> to vector<2x16xf32>
    %50 = arith.addf %47, %49 : vector<2x16xf32>
    %c0_43 = arith.constant 0 : index
    %c0_44 = arith.constant 0 : index
    %51 = vector.load %arg17[%c0_43, %c0_44] : memref<2x16xf32, #tpu.memory_space<vmem>>, vector<2x16xf32>
    tpu.vector_store %arg17[%c0_43, %c0_44], %50 {strides = array<i32>} : memref<2x16xf32, #tpu.memory_space<vmem>>, vector<2x16xf32>,
    return
  }
  func.func @transform_0(%arg0: i32) -> (i32, i32) {
    %c0_i32 = arith.constant 0 : i32
    %c0_i32_0 = arith.constant 0 : i32
    return %arg0, %c0_i32 : i32, i32
  }
  func.func @transform_1(%arg0: i32) -> (i32, i32) {
    %c0_i32 = arith.constant 0 : i32
    %c0_i32_0 = arith.constant 0 : i32
    %c0_i32_1 = arith.constant 0 : i32
    return %c0_i32, %c0_i32_0 : i32, i32
  }
  func.func @transform_2(%arg0: i32) -> (i32, i32) {
    %c0_i32 = arith.constant 0 : i32
    %c0_i32_0 = arith.constant 0 : i32
    %c0_i32_1 = arith.constant 0 : i32
    return %c0_i32, %c0_i32_0 : i32, i32
  }
  func.func @transform_3(%arg0: i32) -> (i32, i32) {
    %c0_i32 = arith.constant 0 : i32
    %c0_i32_0 = arith.constant 0 : i32
    %c0_i32_1 = arith.constant 0 : i32
    return %c0_i32, %c0_i32_0 : i32, i32
  }
  func.func @transform_4(%arg0: i32) -> (i32, i32) {
    %c0_i32 = arith.constant 0 : i32
    %c0_i32_0 = arith.constant 0 : i32
    %c0_i32_1 = arith.constant 0 : i32
    return %c0_i32, %c0_i32_0 : i32, i32
  }
  func.func @transform_5(%arg0: i32) -> (i32, i32) {
    %c0_i32 = arith.constant 0 : i32
    %c0_i32_0 = arith.constant 0 : i32
    %c0_i32_1 = arith.constant 0 : i32
    return %c0_i32, %c0_i32_0 : i32, i32
  }
  func.func @transform_6(%arg0: i32) -> (i32, i32) {
    %c0_i32 = arith.constant 0 : i32
    %c0_i32_0 = arith.constant 0 : i32
    %c0_i32_1 = arith.constant 0 : i32
    return %c0_i32, %c0_i32_0 : i32, i32
  }
  func.func @transform_7(%arg0: i32) -> (i32, i32) {
    %c0_i32 = arith.constant 0 : i32
    %c0_i32_0 = arith.constant 0 : i32
    %c0_i32_1 = arith.constant 0 : i32
    return %c0_i32, %c0_i32_0 : i32, i32
  }
  func.func @transform_8(%arg0: i32) -> (i32, i32) {
    %c0_i32 = arith.constant 0 : i32
    %c0_i32_0 = arith.constant 0 : i32
    %c0_i32_1 = arith.constant 0 : i32
    return %c0_i32, %c0_i32_0 : i32, i32
  }
  func.func @transform_9(%arg0: i32) -> (i32, i32) {
    %c0_i32 = arith.constant 0 : i32
    %c0_i32_0 = arith.constant 0 : i32
    %c0_i32_1 = arith.constant 0 : i32
    return %c0_i32, %c0_i32_0 : i32, i32
  }
  func.func @transform_10(%arg0: i32) -> (i32, i32) {
    %c0_i32 = arith.constant 0 : i32
    %c0_i32_0 = arith.constant 0 : i32
    %c0_i32_1 = arith.constant 0 : i32
    return %c0_i32, %c0_i32_0 : i32, i32
  }
  func.func @transform_11(%arg0: i32) -> (i32, i32) {
    %c0_i32 = arith.constant 0 : i32
    %c0_i32_0 = arith.constant 0 : i32
    %c0_i32_1 = arith.constant 0 : i32
    return %c0_i32, %c0_i32_0 : i32, i32
  }
  func.func @transform_12(%arg0: i32) -> (i32, i32) {
    %c0_i32 = arith.constant 0 : i32
    %c0_i32_0 = arith.constant 0 : i32
    %c0_i32_1 = arith.constant 0 : i32
    return %c0_i32, %c0_i32_0 : i32, i32
  }
  func.func @transform_13(%arg0: i32) -> (i32, i32) {
    %c0_i32 = arith.constant 0 : i32
    %c0_i32_0 = arith.constant 0 : i32
    %c0_i32_1 = arith.constant 0 : i32
    return %c0_i32, %c0_i32_0 : i32, i32
  }
  func.func @transform_14(%arg0: i32) -> (i32, i32) {
    %c0_i32 = arith.constant 0 : i32
    %c0_i32_0 = arith.constant 0 : i32
    %c0_i32_1 = arith.constant 0 : i32
    return %c0_i32, %c0_i32_0 : i32, i32
  }
  func.func @transform_15(%arg0: i32) -> (i32, i32) {
    %c0_i32 = arith.constant 0 : i32
    %c0_i32_0 = arith.constant 0 : i32
    %c0_i32_1 = arith.constant 0 : i32
    return %c0_i32, %c0_i32_0 : i32, i32
  }
  func.func @transform_16(%arg0: i32) -> (i32, i32) {
    %c0_i32 = arith.constant 0 : i32
    %c0_i32_0 = arith.constant 0 : i32
    return %arg0, %c0_i32 : i32, i32
  }
}

</mosaic_0001>

<bundles_post_ra>
// kernel: _tide_forward.1
= control target key start
LH: loop header
LB: loop body
LE: loop exit
PB: predicated region body
PF: predicated region fallthrough
CT: control target
= control target key end

     0   :  { %s1910_s0 = inlined_call_operand.vmem [shape: bf16[2,32], index: 0, kind: input, shape index: {}]   ;;  %s1911_s1 = inlined_call_operand.vmem [shape: bf16[32,128], index: 1, kind: input, shape index: {}]   ;;  %s1912_s2 = inlined_call_operand.hbm [shape: f32[1,128], index: 2, kind: input, shape index: {}]   ;;  %s1913_s3 = inlined_call_operand.vmem [shape: bf16[128,128], index: 3, kind: input, shape index: {}]   ;;  %s1914_s4 = inlined_call_operand.vmem [shape: bf16[32,128], index: 4, kind: input, shape index: {}]   ;;  %s1915_s5 = inlined_call_operand.hbm [shape: f32[1,128], index: 5, kind: input, shape index: {}]   ;;  %s1916_s6 = inlined_call_operand.vmem [shape: bf16[128,128], index: 6, kind: input, shape index: {}]   ;;  %s1917_s7 = inlined_call_operand.hbm [shape: f32[1,128], index: 7, kind: input, shape index: {}]   ;;  %s1918_s8 = inlined_call_operand.vmem [shape: bf16[128,128], index: 8, kind: input, shape index: {}]   ;;  %s1919_s9 = inlined_call_operand.vmem [shape: bf16[128,128], index: 9, kind: input, shape index: {}]   ;;  %s1920_s10 = inlined_call_operand.vmem [shape: f32[1,128], index: 10, kind: input, shape index: {}]   ;;  %s1921_s11 = inlined_call_operand.vmem [shape: bf16[128,16], index: 11, kind: input, shape index: {}]   ;;  %s1922_s12 = inlined_call_operand.vmem [shape: bf16[128,16], index: 12, kind: input, shape index: {}]   ;;  %s1923_s13 = inlined_call_operand.vmem [shape: bf16[128,16], index: 13, kind: input, shape index: {}]   ;;  %s1924_s14 = inlined_call_operand.vmem [shape: bf16[32,16], index: 14, kind: input, shape index: {}]   ;;  %s1925_s15 = inlined_call_operand.vmem [shape: f32[1,16], index: 15, kind: input, shape index: {}]   ;;  %s1926_s16 = inlined_call_operand.vmem [shape: f32[2,16], index: 16, kind: output, shape index: {}]  }
   0x1   :  { %1927 = sst [smem:[#allocation9_spill]] %s1910_s0 }
   0x2   :  { %21 = vsyncpa [#allocation3], 0 }
   0x3   :  { %22 = vsyncpa [#allocation5], 0  ;;  %s1488_s21 = smov [#allocation4]   ;;  %s1489_s23 = smov [#allocation2]  }
   0x4   :  { %s47_s22 = sshll.u32 %s1488_s21, 4  ;;  %s33_s24 = sshll.u32 %s1489_s23, 4  ;;  %s48_s22 = int_to_ptr.vmem [resolvable:$true] %s47_s22  ;;  %s34_s24 = int_to_ptr.vmem [resolvable:$true] %s33_s24 }
   0x5   :  { %s1418_s27 = scalar_lea.hbm %s1915_s5, 16 }
   0x6   :  { %p1419_p0 = scmp.ne.s32.totalorder %s1915_s5, %s1418_s27  ;;  %p1422_p1 = scmp.lt.u32.totalorder %s1418_s27, %s1915_s5 }
   0x8   :  { %p1424_p2 = pnand %p1422_p1, %p1419_p0 }
   0xa   :  { %1427 = shalt.err (!%p1424_p2)
}
   0xb   :  { %s1428_s17 = scalar_lea.vmem %s48_s22, 16  ;;  %s1432_s18 = scalar_lea.vmem %s48_s22, 32 }
   0xc   :  { %p1429_p3 = scmp.ne.s32.totalorder %s48_s22, %s1428_s17  ;;  %p1433_p4 = scmp.lt.s32.totalorder %s48_s22, %s48_s22 }
   0xd   :  { %p1434_p5 = scmp.lt.s32.totalorder %s1432_s18, %s1428_s17 }
   0xf   :  { %p1435_p6 = por %p1434_p5, %p1433_p4 }
  0x11   :  { %p1436_p7 = pnand %p1435_p6, %p1429_p3 }
  0x13   :  { %1439 = shalt.err (!%p1436_p7)
}
  0x14   :  { %50 = dma.hbm_to_vmem [thread:$0]  %s1915_s5, 16, %s48_s22, [#allocation5]  }
  0x15   :  { %s1440_s25 = scalar_lea.hbm %s1912_s2, 16 }
  0x16   :  { %p1441_p8 = scmp.ne.s32.totalorder %s1912_s2, %s1440_s25  ;;  %p1444_p9 = scmp.lt.u32.totalorder %s1440_s25, %s1912_s2 }
  0x18   :  { %p1446_p10 = pnand %p1444_p9, %p1441_p8 }
  0x1a   :  { %1449 = shalt.err (!%p1446_p10)
}
  0x1b   :  { %s1450_s30 = scalar_lea.vmem %s34_s24, 16  ;;  %s1454_s0 = scalar_lea.vmem %s34_s24, 32 }
  0x1c   :  { %p1451_p11 = scmp.ne.s32.totalorder %s34_s24, %s1450_s30  ;;  %p1455_p12 = scmp.lt.s32.totalorder %s34_s24, %s34_s24 }
  0x1d   :  { %p1456_p13 = scmp.lt.s32.totalorder %s1454_s0, %s1450_s30 }
  0x1f   :  { %p1457_p0 = por %p1456_p13, %p1455_p12 }
  0x21   :  { %p1458_p1 = pnand %p1457_p0, %p1451_p11 }
  0x23   :  { %1461 = shalt.err (!%p1458_p1)
}
  0x24   :  { %36 = dma.hbm_to_vmem [thread:$0]  %s1912_s2, 16, %s34_s24, [#allocation3]  }
  0x25   :  { %s1490_s17 = smov [#allocation6]   ;;  %s1462_s21 = scalar_lea.hbm %s1917_s7, 16 }
  0x26   :  { %s59_s18 = sshll.u32 %s1490_s17, 4  ;;  %p1463_p2 = scmp.ne.s32.totalorder %s1917_s7, %s1462_s21  ;;  %s60_s18 = int_to_ptr.vmem [resolvable:$true] %s59_s18 }
  0x27   :  { %p1466_p3 = scmp.lt.u32.totalorder %s1462_s21, %s1917_s7 }
  0x29   :  { %p1468_p4 = pnand %p1466_p3, %p1463_p2 }
  0x2b   :  { %1471 = shalt.err (!%p1468_p4)
}
  0x2c   :  { %s1472_s28 = scalar_lea.vmem %s60_s18, 16  ;;  %s1476_s2 = scalar_lea.vmem %s60_s18, 32 }
  0x2d   :  { %p1473_p5 = scmp.ne.s32.totalorder %s60_s18, %s1472_s28  ;;  %p1477_p6 = scmp.lt.s32.totalorder %s60_s18, %s60_s18 }
  0x2e   :  { %p1478_p7 = scmp.lt.s32.totalorder %s1476_s2, %s1472_s28 }
  0x30   :  { %p1479_p8 = por %p1478_p7, %p1477_p6 }
  0x32   :  { %p1480_p9 = pnand %p1479_p8, %p1473_p5 }
  0x34   :  { %1483 = shalt.err (!%p1480_p9)
}
  0x35   :  { %62 = dma.hbm_to_vmem [thread:$0]  %s1917_s7, 16, %s60_s18, [#allocation5]  }
  0x36   :  { %1484 = dma.done.wait [#allocation3], 16  }
  0x37   :  { %1485 = vsyncadd [#allocation3], 4294967280 }
  0x38   :  { %1486 = dma.done.wait [#allocation5], 32  }
  0x39   :  { %1487 = vsyncadd [#allocation5], 4294967264  ;;  %v1491_v0 = vmov 0.0   ;;  %vm1492_vm0 = vmmov 0   ;;  %v1356_v1 = vld [vmem:[%s1911_s1] sm:$0xff]   ;;  %v1357_v2 = vld [vmem:[%s1911_s1 + $0x8] sm:$0xff]  }
  0x3a   :  { %1187 = vmatprep.subr.bf16.mxu1 %v1491_v0  ;;  %1191 = vmatprep.mubr.msk.bf16.mxu1 %vm1492_vm0, %v1491_v0  ;;  %v1358_v3 = vld [vmem:[%s1913_s3] sm:$0xff]   ;;  %vm113_vm1 = vcmask 261120   ;;  %v1359_v4 = vld [vmem:[%s1913_s3 + $0x8] sm:$0xff]   ;;  %s1928_s23 = sld [smem:[#allocation9_spill]]  ;;  %v1360_v6 = vld [vmem:[%s1913_s3 + $0x10] sm:$0xff]   ;;  %vm1037_vm2 = vcmask 123904  }
  0x3b   :  { %1203 = vmatprep.subr.bf16.mxu0 %v1491_v0  ;;  %1219 = vmatprep.mubr.msk.bf16.mxu0 %vm1492_vm0, %v1491_v0  ;;  %v1364_v7 = vld [vmem:[%s1914_s4] sm:$0xff]   ;;  %v1361_v8 = vld [vmem:[%s1913_s3 + $0x18] sm:$0xff]   ;;  %v1363_v10 = vld [vmem:[%s1913_s3 + $0x28] sm:$0xff]  }
  0x3c   :  { %1188 = vmatpush3.bf16.msra.mxu1 %v1356_v1  ;;  %1204 = vmatpush3.bf16.msra.mxu0 %v1358_v3  ;;  %v1362_v9 = vld [vmem:[%s1913_s3 + $0x20] sm:$0xff]   ;;  %v1365_v11 = vld [vmem:[%s1913_s3 + $0x30] sm:$0xff]   ;;  %v1366_v12 = vld [vmem:[%s1914_s4 + $0x8] sm:$0xff]  }
  0x3d   :  { %1189 = vmatprep.subr.bf16.mxu1 %v1491_v0  ;;  %1205 = vmatprep.subr.bf16.mxu0 %v1491_v0  ;;  %v1367_v13 = vld [vmem:[%s1913_s3 + $0x38] sm:$0xff]   ;;  %v1368_v14 = vld [vmem:[%s1916_s6] sm:$0xff]   ;;  %v1370_v15 = vld [vmem:[%s1916_s6 + $0x8] sm:$0xff]  }
  0x3e   :  { %v1372_v16 = vld [vmem:[%s1916_s6 + $0x10] sm:$0xff]   ;;  %v1374_v17 = vld [vmem:[%s1916_s6 + $0x18] sm:$0xff]   ;;  %v1376_v18 = vld [vmem:[%s1916_s6 + $0x20] sm:$0xff]  }
  0x3f   :  { %v1378_v19 = vld [vmem:[%s1916_s6 + $0x28] sm:$0xff]   ;;  %v1045_v20 = vld [vmem:[#allocation2] ss:$0 sm:$0xff]  ;;  %v1369_v27 = vld [vmem:[%s1919_s9] sm:$0xff]  }
  0x40   :  { %1190 = vmatpush3.bf16.msra.mxu1 %v1357_v2  ;;  %v1636_v5 = vld [vmem:[%s1928_s23] sm:$0x1]  ;;  %1206 = vmatpush3.bf16.msra.mxu0 %v1359_v4  ;;  %v1371_v29 = vld [vmem:[%s1919_s9 + $0x8] sm:$0xff]   ;;  %v1373_v30 = vld [vmem:[%s1919_s9 + $0x10] sm:$0xff]  }
  0x41   :  { %1195 = vmatprep.subr.bf16.mxu1 %v1491_v0  ;;  %1207 = vmatprep.subr.bf16.mxu0 %v1491_v0  ;;  %v1375_v31 = vld [vmem:[%s1919_s9 + $0x18] sm:$0xff]   ;;  %v1377_v32 = vld [vmem:[%s1919_s9 + $0x20] sm:$0xff]   ;;  %v1379_v33 = vld [vmem:[%s1919_s9 + $0x28] sm:$0xff]  }
  0x42   :  { %v1380_v36 = vld [vmem:[%s1916_s6 + $0x30] sm:$0xff]   ;;  %v1382_v40 = vld [vmem:[%s1916_s6 + $0x38] sm:$0xff]   ;;  %v1384_v49 = vld [vmem:[%s1922_s12] sm:$0xff]  }
  0x43   :  { %1192 = vmatmul.mubr.msk.bf16.vlgmr.msra.gmra.mrb[0].mxu1 %vm113_vm1, %v1636_v5  ;;  %v1381_v37 = vld [vmem:[%s1919_s9 + $0x30] sm:$0xff]   ;;  %v1383_v41 = vld [vmem:[%s1919_s9 + $0x38] sm:$0xff]   ;;  %v1385_v50 = vld [vmem:[%s1918_s8] sm:$0xff]  }
  0x44   :  { %1199 = vmatprep.mubr.msk.bf16.mxu1 %vm1492_vm0, %v1491_v0  ;;  %1196 = vmatpush3.bf16.msra.mxu1 %v1364_v7  ;;  %v1060_v43 = vld [vmem:[#allocation4] ss:$0 sm:$0xff]  ;;  %v1386_v52 = vld [vmem:[%s1922_s12 + $0x8] sm:$0xff]   ;;  %v1388_v54 = vld [vmem:[%s1922_s12 + $0x10] sm:$0xff]  }
  0x45   :  { %1197 = vmatprep.subr.bf16.mxu1 %v1491_v0  ;;  %1208 = vmatpush3.bf16.msra.mxu0 %v1360_v6  ;;  %v1387_v53 = vld [vmem:[%s1918_s8 + $0x8] sm:$0xff]   ;;  %v1389_v55 = vld [vmem:[%s1918_s8 + $0x10] sm:$0xff]   ;;  %v1390_v56 = vld [vmem:[%s1922_s12 + $0x18] sm:$0xff]  }
  0x46   :  { %1209 = vmatprep.subr.bf16.mxu0 %v1491_v0  ;;  %v1391_v57 = vld [vmem:[%s1918_s8 + $0x18] sm:$0xff]   ;;  %v1392_v58 = vld [vmem:[%s1922_s12 + $0x20] sm:$0xff]   ;;  %v1394_v60 = vld [vmem:[%s1922_s12 + $0x28] sm:$0xff]  }
  0x47   :  { %v1393_v59 = vld [vmem:[%s1918_s8 + $0x20] sm:$0xff]   ;;  %v1395_v61 = vld [vmem:[%s1918_s8 + $0x28] sm:$0xff]   ;;  %v1396_v62 = vld [vmem:[%s1922_s12 + $0x30] sm:$0xff]  }
  0x48   :  { %1198 = vmatpush3.bf16.msra.mxu1 %v1366_v12  ;;  %v1397_v63 = vld [vmem:[%s1918_s8 + $0x30] sm:$0xff]   ;;  %v1398_v1 = vld [vmem:[%s1922_s12 + $0x38] sm:$0xff]  }
  0x49   :  { %1210 = vmatpush3.bf16.msra.mxu0 %v1361_v8  ;;  %1223 = vmatprep.subr.bf16.mxu1 %v1491_v0  ;;  %v1399_v2 = vld [vmem:[%s1918_s8 + $0x38] sm:$0xff]  }
  0x4a   :  { %1211 = vmatprep.subr.bf16.mxu0 %v1491_v0  ;;  %v1061_v3 = vld [vmem:[#allocation6] ss:$0 sm:$0xff] }
  0x4b   :  { %1200 = vmatmul.mubr.msk.bf16.vlgmr.msra.gmra.mrb[4].mxu1 %vm113_vm1, %v1636_v5 }
  0x4c   :  { %1239 = vmatprep.mubr.msk.bf16.mxu1 %vm1492_vm0, %v1491_v0  ;;  %1224 = vmatpush3.bf16.msra.mxu1 %v1368_v14 }
  0x4d   :  { %1212 = vmatpush3.bf16.msra.mxu0 %v1362_v9  ;;  %1225 = vmatprep.subr.bf16.mxu1 %v1491_v0 }
  0x4e   :  { %1213 = vmatprep.subr.bf16.mxu0 %v1491_v0 }
  0x50   :  { %1226 = vmatpush3.bf16.msra.mxu1 %v1370_v15  ;;  %v1400_v15 = vld [vmem:[%s1923_s13] sm:$0xff]  }
  0x51   :  { %1214 = vmatpush3.bf16.msra.mxu0 %v1363_v10  ;;  %1227 = vmatprep.subr.bf16.mxu1 %v1491_v0 }
  0x52   :  { %1215 = vmatprep.subr.bf16.mxu0 %v1491_v0 }
  0x54   :  { %1228 = vmatpush3.bf16.msra.mxu1 %v1372_v16 }
  0x55   :  { %1216 = vmatpush3.bf16.msra.mxu0 %v1365_v11  ;;  %1229 = vmatprep.subr.bf16.mxu1 %v1491_v0 }
  0x56   :  { %1217 = vmatprep.subr.bf16.mxu0 %v1491_v0 }
  0x58   :  { %1230 = vmatpush3.bf16.msra.mxu1 %v1374_v17  ;;  %v1408_v17 = vld [vmem:[%s1921_s11] sm:$0xff]  }
  0x59   :  { %1218 = vmatpush3.bf16.msra.mxu0 %v1367_v13  ;;  %1231 = vmatprep.subr.bf16.mxu1 %v1491_v0 }
  0x5a   :  { %1243 = vmatprep.subr.bf16.mxu0 %v1491_v0 }
  0x5c   :  { %1232 = vmatpush3.bf16.msra.mxu1 %v1376_v18  ;;  %v1401_v18 = vld [vmem:[%s1923_s13 + $0x8] sm:$0xff]  }
  0x5d   :  { %1233 = vmatprep.subr.bf16.mxu1 %v1491_v0 }
  0x60   :  { %1234 = vmatpush3.bf16.msra.mxu1 %v1378_v19  ;;  %v1409_v19 = vld [vmem:[%s1921_s11 + $0x8] sm:$0xff]  }
  0x61   :  { %1235 = vmatprep.subr.bf16.mxu1 %v1491_v0 }
  0x64   :  { %1236 = vmatpush3.bf16.msra.mxu1 %v1380_v36 }
  0x65   :  { %1237 = vmatprep.subr.bf16.mxu1 %v1491_v0 }
  0x68   :  { %1238 = vmatpush3.bf16.msra.mxu1 %v1382_v40 }
  0x69   :  { %1263 = vmatprep.subr.bf16.mxu1 %v1491_v0 }
 0x116   :  { %v151_v21 = vpop.f32.mrb[0].mxu1 }
 0x117   :  { %v152_v22 = vadd.f32 %v1045_v20, %v151_v21  ;;  %v1193_v23 = vpop.f32.mrb[1].mxu1  ;;  %v1402_v20 = vld [vmem:[%s1923_s13 + $0x10] sm:$0xff]  }
 0x118   :  { %v154_v24 = vpop.f32.mrb[2].mxu1  ;;  %v1410_v21 = vld [vmem:[%s1921_s11 + $0x10] sm:$0xff]   ;;  %v1411_v23 = vld [vmem:[%s1921_s11 + $0x18] sm:$0xff]  }
 0x119   :  { %v157_v25 = vmax.f32 %v152_v22, 0.0  ;;  %v1194_v26 = vpop.f32.mrb[3].mxu1  ;;  %v1403_v22 = vld [vmem:[%s1923_s13 + $0x18] sm:$0xff]   ;;  %v1404_v24 = vld [vmem:[%s1923_s13 + $0x20] sm:$0xff]  }
 0x11a   :  { %v1405_v26 = vld [vmem:[%s1923_s13 + $0x28] sm:$0xff]  }
 0x11b   :  { %v158_v28 = vpack.c.bf16 %v157_v25, %v157_v25  ;;  %v1412_v25 = vld [vmem:[%s1921_s11 + $0x20] sm:$0xff]  }
 0x11d   :  { %1220 = vmatmul.mubr.bf16.vlgmr.msra.gmra.mrb[0].mxu0 %v158_v28  ;;  %v1406_v28 = vld [vmem:[%s1923_s13 + $0x30] sm:$0xff]  }
 0x11e   :  { %1244 = vmatpush3.bf16.msra.mxu0 %v1369_v27  ;;  %1259 = vmatprep.mubr.msk.bf16.mxu0 %vm1492_vm0, %v1491_v0  ;;  %v225_v34 = vpop.f32.mrb[4].mxu1  ;;  %v1413_v27 = vld [vmem:[%s1921_s11 + $0x28] sm:$0xff]  }
 0x11f   :  { %1245 = vmatprep.subr.bf16.mxu0 %v1491_v0  ;;  %v1201_v35 = vpop.f32.mrb[5].mxu1 }
 0x120   :  { %v228_v38 = vpop.f32.mrb[6].mxu1 }
 0x121   :  { %v1202_v39 = vpop.f32.mrb[7].mxu1 }
 0x122   :  { %1246 = vmatpush3.bf16.msra.mxu0 %v1371_v29  ;;  %v1407_v29 = vld [vmem:[%s1923_s13 + $0x38] sm:$0xff]  }
 0x123   :  { %1247 = vmatprep.subr.bf16.mxu0 %v1491_v0 }
 0x126   :  { %1248 = vmatpush3.bf16.msra.mxu0 %v1373_v30  ;;  %v1414_v30 = vld [vmem:[%s1921_s11 + $0x30] sm:$0xff]  }
 0x127   :  { %1249 = vmatprep.subr.bf16.mxu0 %v1491_v0 }
 0x12a   :  { %1250 = vmatpush3.bf16.msra.mxu0 %v1375_v31  ;;  %v1415_v31 = vld [vmem:[%s1921_s11 + $0x38] sm:$0xff]  }
 0x12b   :  { %1251 = vmatprep.subr.bf16.mxu0 %v1491_v0 }
 0x12e   :  { %1252 = vmatpush3.bf16.msra.mxu0 %v1377_v32 }
 0x12f   :  { %1253 = vmatprep.subr.bf16.mxu0 %v1491_v0 }
 0x132   :  { %1254 = vmatpush3.bf16.msra.mxu0 %v1379_v33  ;;  %v1086_v33 = vld [vmem:[%s1920_s10] ss:$0 sm:$0xff] }
 0x133   :  { %1255 = vmatprep.subr.bf16.mxu0 %v1491_v0 }
 0x136   :  { %1256 = vmatpush3.bf16.msra.mxu0 %v1381_v37 }
 0x137   :  { %1257 = vmatprep.subr.bf16.mxu0 %v1491_v0 }
 0x13a   :  { %1258 = vmatpush3.bf16.msra.mxu0 %v1383_v41 }
 0x13b   :  { %1283 = vmatprep.subr.bf16.mxu0 %v1491_v0 }
 0x1f0   :  { %v313_v42 = vpop.f32.mrb[0].mxu0 }
 0x1f1   :  { %v314_v44 = vadd.f32 %v313_v42, %v225_v34  ;;  %v1221_v45 = vpop.f32.mrb[1].mxu0 }
 0x1f2   :  { %v316_v46 = vpop.f32.mrb[2].mxu0 }
 0x1f3   :  { %v326_v47 = vadd.f32 %v1060_v43, %v314_v44  ;;  %v1222_v48 = vpop.f32.mrb[3].mxu0  ;;  %v1416_v44 = vld [vmem:[%s1924_s14] sm:$0xff]   ;;  %v1417_v46 = vld [vmem:[%s1924_s14 + $0x8] sm:$0xff]  }
 0x1f5   :  { %v1753_v51 = vpack.c.bf16 %v326_v47, %v326_v47 }
 0x1f7   :  { %1240 = vmatmul.mubr.bf16.vlgmr.msra.gmra.mrb[8].mxu1 %v1753_v51  ;;  %1260 = vmatmul.mubr.bf16.vlgmr.msra.gmra.mrb[4].mxu0 %v1753_v51 }
 0x1f8   :  { %1284 = vmatpush3.bf16.msra.mxu0 %v1384_v49  ;;  %1264 = vmatpush3.bf16.msra.mxu1 %v1385_v50 }
 0x1f9   :  { %1285 = vmatprep.subr.bf16.mxu0 %v1491_v0  ;;  %1265 = vmatprep.subr.bf16.mxu1 %v1491_v0 }
 0x1fa   :  { %1279 = vmatprep.mubr.msk.bf16.mxu1 %vm1492_vm0, %v1491_v0  ;;  %1299 = vmatprep.mubr.msk.bf16.mxu0 %vm1492_vm0, %v1491_v0 }
 0x1fc   :  { %1286 = vmatpush3.bf16.msra.mxu0 %v1386_v52  ;;  %1266 = vmatpush3.bf16.msra.mxu1 %v1387_v53 }
 0x1fd   :  { %1287 = vmatprep.subr.bf16.mxu0 %v1491_v0  ;;  %1267 = vmatprep.subr.bf16.mxu1 %v1491_v0 }
 0x200   :  { %1288 = vmatpush3.bf16.msra.mxu0 %v1388_v54  ;;  %1268 = vmatpush3.bf16.msra.mxu1 %v1389_v55 }
 0x201   :  { %1289 = vmatprep.subr.bf16.mxu0 %v1491_v0  ;;  %1269 = vmatprep.subr.bf16.mxu1 %v1491_v0 }
 0x204   :  { %1290 = vmatpush3.bf16.msra.mxu0 %v1390_v56  ;;  %1270 = vmatpush3.bf16.msra.mxu1 %v1391_v57 }
 0x205   :  { %1291 = vmatprep.subr.bf16.mxu0 %v1491_v0  ;;  %1271 = vmatprep.subr.bf16.mxu1 %v1491_v0 }
 0x208   :  { %1292 = vmatpush3.bf16.msra.mxu0 %v1392_v58  ;;  %1272 = vmatpush3.bf16.msra.mxu1 %v1393_v59  ;;  %v1114_v58 = vld [vmem:[%s1925_s15] ss:$0 sm:$0xff] }
 0x209   :  { %1293 = vmatprep.subr.bf16.mxu0 %v1491_v0  ;;  %1273 = vmatprep.subr.bf16.mxu1 %v1491_v0 }
 0x20c   :  { %1294 = vmatpush3.bf16.msra.mxu0 %v1394_v60  ;;  %1274 = vmatpush3.bf16.msra.mxu1 %v1395_v61 }
 0x20d   :  { %1295 = vmatprep.subr.bf16.mxu0 %v1491_v0  ;;  %1275 = vmatprep.subr.bf16.mxu1 %v1491_v0 }
 0x210   :  { %1296 = vmatpush3.bf16.msra.mxu0 %v1396_v62  ;;  %1276 = vmatpush3.bf16.msra.mxu1 %v1397_v63 }
 0x211   :  { %1297 = vmatprep.subr.bf16.mxu0 %v1491_v0  ;;  %1277 = vmatprep.subr.bf16.mxu1 %v1491_v0 }
 0x214   :  { %1298 = vmatpush3.bf16.msra.mxu0 %v1398_v1  ;;  %1278 = vmatpush3.bf16.msra.mxu1 %v1399_v2 }
 0x215   :  { %1323 = vmatprep.subr.bf16.mxu0 %v1491_v0  ;;  %1303 = vmatprep.subr.bf16.mxu1 %v1491_v0 }
 0x2ca   :  { %v433_v4 = vpop.f32.mrb[8].mxu1  ;;  %v1819_v6 = vpop.f32.mrb[4].mxu0 }
 0x2cb   :  { %v434_v7 = vadd.f32 %v1061_v3, %v433_v4  ;;  %v1241_v8 = vpop.f32.mrb[9].mxu1  ;;  %v1261_v9 = vpop.f32.mrb[5].mxu0 }
 0x2cc   :  { %v436_v10 = vpop.f32.mrb[10].mxu1  ;;  %v558_v11 = vpop.f32.mrb[6].mxu0 }
 0x2cd   :  { %v439_v12 = vmax.f32 %v434_v7, 0.0  ;;  %v1242_v13 = vpop.f32.mrb[11].mxu1  ;;  %v1262_v14 = vpop.f32.mrb[7].mxu0 }
 0x2cf   :  { %v440_v16 = vpack.c.bf16 %v439_v12, %v439_v12 }
 0x2d1   :  { %1280 = vmatmul.mubr.bf16.vlgmr.msra.gmra.mrb[12].mxu1 %v440_v16  ;;  %1300 = vmatmul.mubr.bf16.vlgmr.msra.gmra.mrb[8].mxu0 %v440_v16 }
 0x2d2   :  { %1324 = vmatpush3.bf16.msra.mxu0 %v1400_v15  ;;  %1339 = vmatprep.mubr.msk.bf16.mxu0 %vm1492_vm0, %v1491_v0 }
 0x2d3   :  { %1325 = vmatprep.subr.bf16.mxu0 %v1491_v0  ;;  %1304 = vmatpush3.bf16.msra.mxu1 %v1408_v17 }
 0x2d4   :  { %1305 = vmatprep.subr.bf16.mxu1 %v1491_v0  ;;  %1319 = vmatprep.mubr.msk.bf16.mxu1 %vm1492_vm0, %v1491_v0 }
 0x2d6   :  { %1326 = vmatpush3.bf16.msra.mxu0 %v1401_v18 }
 0x2d7   :  { %1327 = vmatprep.subr.bf16.mxu0 %v1491_v0  ;;  %1306 = vmatpush3.bf16.msra.mxu1 %v1409_v19 }
 0x2d8   :  { %1307 = vmatprep.subr.bf16.mxu1 %v1491_v0 }
 0x2da   :  { %1328 = vmatpush3.bf16.msra.mxu0 %v1402_v20 }
 0x2db   :  { %1329 = vmatprep.subr.bf16.mxu0 %v1491_v0  ;;  %1308 = vmatpush3.bf16.msra.mxu1 %v1410_v21 }
 0x2dc   :  { %1309 = vmatprep.subr.bf16.mxu1 %v1491_v0 }
 0x2de   :  { %1330 = vmatpush3.bf16.msra.mxu0 %v1403_v22 }
 0x2df   :  { %1331 = vmatprep.subr.bf16.mxu0 %v1491_v0  ;;  %1310 = vmatpush3.bf16.msra.mxu1 %v1411_v23 }
 0x2e0   :  { %1311 = vmatprep.subr.bf16.mxu1 %v1491_v0 }
 0x2e2   :  { %1332 = vmatpush3.bf16.msra.mxu0 %v1404_v24 }
 0x2e3   :  { %1333 = vmatprep.subr.bf16.mxu0 %v1491_v0  ;;  %1312 = vmatpush3.bf16.msra.mxu1 %v1412_v25 }
 0x2e4   :  { %1313 = vmatprep.subr.bf16.mxu1 %v1491_v0 }
 0x2e6   :  { %1334 = vmatpush3.bf16.msra.mxu0 %v1405_v26 }
 0x2e7   :  { %1335 = vmatprep.subr.bf16.mxu0 %v1491_v0  ;;  %1314 = vmatpush3.bf16.msra.mxu1 %v1413_v27 }
 0x2e8   :  { %1315 = vmatprep.subr.bf16.mxu1 %v1491_v0 }
 0x2ea   :  { %1336 = vmatpush3.bf16.msra.mxu0 %v1406_v28 }
 0x2eb   :  { %1337 = vmatprep.subr.bf16.mxu0 %v1491_v0  ;;  %1316 = vmatpush3.bf16.msra.mxu1 %v1414_v30 }
 0x2ec   :  { %1317 = vmatprep.subr.bf16.mxu1 %v1491_v0 }
 0x2ee   :  { %1338 = vmatpush3.bf16.msra.mxu0 %v1407_v29 }
 0x2ef   :  { %1318 = vmatpush3.bf16.msra.mxu1 %v1415_v31 }
 0x2f0   :  { %1343 = vmatprep.subr.bf16.mxu1 %v1491_v0 }
 0x2f1   :  { %1340 = vmatmul.mubr.bf16.vlgmr.msra.gmra.mrb[12].mxu0 %v1753_v51 }
 0x3a4   :  { %v643_v32 = vpop.f32.mrb[12].mxu1  ;;  %v773_v34 = vpop.f32.mrb[8].mxu0 }
 0x3a5   :  { %v644_v35 = vadd.f32 %v643_v32, %v1819_v6  ;;  %v1281_v36 = vpop.f32.mrb[13].mxu1  ;;  %v1301_v37 = vpop.f32.mrb[9].mxu0 }
 0x3a6   :  { %v646_v38 = vpop.f32.mrb[14].mxu1  ;;  %v776_v39 = vpop.f32.mrb[10].mxu0 }
 0x3a7   :  { %v656_v40 = vadd.f32 %v1086_v33, %v644_v35  ;;  %v1282_v41 = vpop.f32.mrb[15].mxu1  ;;  %v1302_v42 = vpop.f32.mrb[11].mxu0 }
 0x3a9   :  { %v657_v43 = vmax.f32 %v656_v40, 0.0 }
 0x3ab   :  { %v658_v45 = vpack.c.bf16 %v657_v43, %v657_v43 }
 0x3ad   :  { %1320 = vmatmul.mubr.bf16.vlgmr.msra.gmra.mrb[16].mxu1 %v658_v45 }
 0x3ae   :  { %1344 = vmatpush3.bf16.msra.mxu1 %v1416_v44  ;;  %1347 = vmatprep.mubr.msk.bf16.mxu1 %vm1492_vm0, %v1491_v0 }
 0x3af   :  { %1345 = vmatprep.subr.bf16.mxu1 %v1491_v0 }
 0x3b2   :  { %1346 = vmatpush3.bf16.msra.mxu1 %v1417_v46 }
 0x3b5   :  { %1348 = vmatmul.mubr.msk.bf16.vlgmr.msra.gmra.mrb[20].mxu1 %vm113_vm1, %v1636_v5 }
 0x3c4   :  { %v965_v47 = vpop.f32.mrb[12].mxu0 }
 0x3c5   :  { %v1341_v48 = vpop.f32.mrb[13].mxu0 }
 0x3c6   :  { %v968_v49 = vpop.f32.mrb[14].mxu0 }
 0x3c7   :  { %v1342_v50 = vpop.f32.mrb[15].mxu0 }
 0x480   :  { %v861_v51 = vpop.f32.mrb[16].mxu1 }
 0x481   :  { %v862_v52 = vadd.f32 %v861_v51, %v773_v34  ;;  %v1321_v53 = vpop.f32.mrb[17].mxu1 }
 0x482   :  { %v864_v54 = vpop.f32.mrb[18].mxu1 }
 0x483   :  { %v1322_v55 = vpop.f32.mrb[19].mxu1  ;;  %v971_v56 = vadd.f32 %v965_v47, %v862_v52 }
 0x488   :  { %v1022_v57 = vpop.f32.mrb[20].mxu1 }
 0x489   :  { %v1028_v0 = vadd.f32 %v1022_v57, %v971_v56  ;;  %v1349_v59 = vpop.f32.mrb[21].mxu1 }
 0x48a   :  { %v1025_v60 = vpop.f32.mrb[22].mxu1 }
 0x48b   :  { %v1036_v5 = vadd.f32 %v1114_v58, %v1028_v0  ;;  %v1350_v61 = vpop.f32.mrb[23].mxu1 }
 0x48d   :  { %1038 = vst.msk [vmem:[%s1926_s16] sm:$0x3] %vm1037_vm2, %v1036_v5 }
 0x48e   :  { %1043 = vsyncpa [#allocation3], 1 }
 0x48f   :  { %1044 = vsyncpa [#allocation5], 1 }

</bundles_post_ra>
